<compile_context>
chip_gen: v5e
topology: v5e:2x2
jax: 0.10.0
libtpu: 0.0.40
codegen_flags: <defaults>
</compile_context>

<pallas_src>
import jax
import jax.numpy as jnp
from jax.experimental import pallas as pl
from jax.experimental.pallas import tpu as pltpu


_LANES = 512                    # lane-dense width (multiple of 128 -> unmasked vst)
_MIN_KERNEL_ELEMS = 8 * 128     # below this a kernel launch is pointless


def _stable_one_minus_exp_neg(t):
    """1 - exp(-t) for t >= 0 without cancellation as t -> 0+.

    Equivalent to -expm1(-t); built only from exp/mul/add/select so it lowers
    on all Mosaic TPU backends.  For t < 0.03 uses the quartic Taylor series
    (relative truncation error < 1e-8 at the cutoff); above, the direct
    formula's cancellation error is already <= ~4e-6 relative.
    """
    poly = t * (1.0 + t * (-0.5 + t * (1.0 / 6.0 - t * (1.0 / 24.0))))
    return jnp.where(t < 0.03, poly, 1.0 - jnp.exp(-t))


def _saturating_poisson_kernel(x_ref, o_ref):
    x = x_ref[...].astype(jnp.float32)      # f32 math (no bf16 VPU/EUP on v5e)
    t = jnp.maximum(x, 0.0)                 # relu
    o_ref[...] = _stable_one_minus_exp_neg(t).astype(o_ref.dtype)


def _round_up(n, m):
    return -(-n // m) * m


def _chip_params():
    """(target block bytes, is_multi_tensorcore) for the current TPU."""
    try:
        kind = jax.devices()[0].device_kind.lower()
    except Exception:
        kind = ""
    if "v7" in kind or "tpu7" in kind:
        # v7x: ~3.2 TB/s HBM -> ~4 MiB blocks amortize grid-step overhead to
        # <15%; 4 MiB x (in+out) x double-buffer = 16 MiB < 32 MiB default.
        return 4 << 20, True
    # v6e: 1 MiB tiles measured at ~85-86% of HBM roofline (flat part of the
    # curve).  v5e: 16 MiB scoped-VMEM default -> 1 MiB x 4 buffers is safe.
    return 1 << 20, False


def _pick_width(n, lanes):
    """Largest lane-aligned (multiple of 128) width dividing n, preferring >=8 rows."""
    candidates = []
    for w in (lanes, 512, 384, 256, 128):
        if w % 128 == 0 and w not in candidates:
            candidates.append(w)
    for w in candidates:
        if n % w == 0 and n // w >= 8:
            return w
    for w in candidates:
        if n % w == 0:
            return w
    return 0


def saturating_poisson(x, *, lanes=_LANES, tile_bytes=None, in_place=True):
    """Elementwise 1 - exp(-relu(x))  (PyTorch SaturatingPoisson.forward).

    in_place=True aliases the kernel output onto the input buffer; donate x
    (jax.jit(..., donate_argnums=0)) to realize the zero-copy benefit.
    """
    assert lanes % 128 == 0, "lanes must be a multiple of 128 (TPU lane width)"

    orig_shape = x.shape
    dtype = x.dtype
    n = x.size

    # Ragged / tiny inputs: one fused XLA elementwise pass is already at the
    # HBM roofline; padding (or kernel-on-bulk + concatenate) would only add
    # whole extra HBM passes, so fall back to plain jnp here.
    width = _pick_width(n, lanes) if n >= _MIN_KERNEL_ELEMS else 0
    if width == 0:
        t = jnp.maximum(x.astype(jnp.float32), 0.0)
        return _stable_one_minus_exp_neg(t).astype(dtype)

    rows = n // width
    x2d = x.reshape(rows, width)             # free bitcast for contiguous input

    default_tile_bytes, multi_core = _chip_params()
    if tile_bytes is None:
        tile_bytes = default_tile_bytes
    itemsize = jnp.dtype(dtype).itemsize
    tr = max(8, (tile_bytes // (width * itemsize)) // 8 * 8)   # multiple of 8
    if multi_core:
        # Keep the "parallel" grid >= ~4 steps so both TensorCores stay busy.
        tr = min(tr, _round_up(pl.cdiv(rows, 4), 8))
    tr = min(tr, rows)
    # (8,128) rule: tr is a multiple of 8 unless it equals `rows`, in which
    # case it is a full-extent block (also legal).

    grid = (pl.cdiv(rows, tr),)              # ragged last block handled by Pallas

    out2d = pl.pallas_call(
        _saturating_poisson_kernel,
        grid=grid,
        in_specs=[pl.BlockSpec((tr, width), lambda i: (i, 0))],
        out_specs=pl.BlockSpec((tr, width), lambda i: (i, 0)),
        out_shape=jax.ShapeDtypeStruct((rows, width), dtype),
        # Same-shape/same-dtype elementwise: reuse the input buffer for the
        # output (halves peak HBM footprint when the caller donates x).
        input_output_aliases={0: 0} if in_place else {},
        compiler_params=pltpu.CompilerParams(
            dimension_semantics=("parallel",)),     # megacore sharding on v7x
    )(x2d)

    return out2d.reshape(orig_shape)


def saturating_poisson_reference(x):
    """Pure-JAX reference mirroring the PyTorch forward exactly."""
    return (1.0 - jnp.exp(-jnp.maximum(x.astype(jnp.float32), 0.0))).astype(x.dtype)


if __name__ == "__main__":
    key = jax.random.PRNGKey(0)
    k1, k2, k3 = jax.random.split(key, 3)

    fn = jax.jit(saturating_poisson)

    # 1) The spec's shape: batch=2, channels=4, 16x16 spatial.
    x1 = jax.random.normal(k1, (2, 4, 16, 16), jnp.float32)
    o1 = jax.block_until_ready(fn(x1))
    r1 = saturating_poisson_reference(x1)
    assert o1.shape == x1.shape and o1.dtype == x1.dtype, "shape/dtype mismatch"
    assert jnp.allclose(o1, r1, atol=1e-6, rtol=1e-5), "value mismatch (case 1)"

    # 2) Force a multi-step grid with a ragged last row-block (small tile_bytes).
    x2 = jax.random.normal(k2, (1, 72, 512), jnp.float32) * 4.0
    o2 = jax.block_until_ready(
        jax.jit(lambda v: saturating_poisson(v, tile_bytes=32 * 1024))(x2))
    assert jnp.allclose(o2, saturating_poisson_reference(x2), atol=1e-6, rtol=1e-5), \
        "value mismatch (case 2)"

    # 3) Lane-unaligned size -> fused jnp fallback path.
    x3 = jax.random.normal(k3, (3, 5, 7), jnp.float32)
    o3 = jax.block_until_ready(fn(x3))
    assert jnp.allclose(o3, saturating_poisson_reference(x3), atol=1e-6, rtol=1e-5), \
        "value mismatch (case 3)"

    # 4) Non-aliased path.
    o4 = jax.block_until_ready(
        jax.jit(lambda v: saturating_poisson(v, in_place=False))(x1))
    assert jnp.allclose(o4, r1, atol=1e-6, rtol=1e-5), "value mismatch (case 4)"

    print("KERNEL_OK")
</pallas_src>

<mosaic_0001>
module attributes {stable_mosaic.version = 11 : i64} {
  func.func @_saturating_poisson_kernel(%arg0: i32, %arg1: memref<8x256xf32, #tpu.memory_space<vmem>>, %arg2: memref<8x256xf32, #tpu.memory_space<vmem>>) attributes {dimension_semantics = [#tpu.dimension_semantics<parallel>], iteration_bounds = array<i64: 1>, scalar_prefetch = 0 : i64, scratch_operands = 0 : i64, tpu.core_type = #tpu.core_type<tc>, window_params = [{transform_indices = @transform_0, window_bounds = array<i64: 8, 256>}, {transform_indices = @transform_1, window_bounds = array<i64: 8, 256>}]} {
    %c0 = arith.constant 0 : index
    %c0_0 = arith.constant 0 : index
    %0 = vector.load %arg1[%c0, %c0_0] : memref<8x256xf32, #tpu.memory_space<vmem>>, vector<8x256xf32>
    %cst = arith.constant 0.000000e+00 : f32
    %1 = vector.broadcast %cst : f32 to vector<8x256xf32>
    %2 = arith.maximumf %0, %1 : vector<8x256xf32>
    %cst_1 = arith.constant 0.0416666679 : f32
    %3 = vector.broadcast %cst_1 : f32 to vector<8x256xf32>
    %4 = arith.mulf %2, %3 : vector<8x256xf32>
    %cst_2 = arith.constant 0.166666672 : f32
    %5 = vector.broadcast %cst_2 : f32 to vector<8x256xf32>
    %6 = arith.subf %5, %4 : vector<8x256xf32>
    %7 = arith.mulf %2, %6 : vector<8x256xf32>
    %cst_3 = arith.constant -5.000000e-01 : f32
    %8 = vector.broadcast %cst_3 : f32 to vector<8x256xf32>
    %9 = arith.addf %8, %7 : vector<8x256xf32>
    %10 = arith.mulf %2, %9 : vector<8x256xf32>
    %cst_4 = arith.constant 1.000000e+00 : f32
    %11 = vector.broadcast %cst_4 : f32 to vector<8x256xf32>
    %12 = arith.addf %11, %10 : vector<8x256xf32>
    %13 = arith.mulf %2, %12 : vector<8x256xf32>
    %cst_5 = arith.constant 3.000000e-02 : f32
    %14 = vector.broadcast %cst_5 : f32 to vector<8x256xf32>
    %15 = arith.cmpf olt, %2, %14 : vector<8x256xf32>
    %cst_6 = arith.constant 0.000000e+00 : f32
    %16 = vector.broadcast %cst_6 : f32 to vector<8x256xf32>
    %17 = arith.subf %16, %2 : vector<8x256xf32>
    %18 = math.exp %17 : vector<8x256xf32>
    %cst_7 = arith.constant 1.000000e+00 : f32
    %19 = vector.broadcast %cst_7 : f32 to vector<8x256xf32>
    %20 = arith.subf %19, %18 : vector<8x256xf32>
    %21 = arith.select %15, %13, %20 : vector<8x256xi1>, vector<8x256xf32>
    %c0_8 = arith.constant 0 : index
    %c0_9 = arith.constant 0 : index
    %22 = vector.load %arg2[%c0_8, %c0_9] : memref<8x256xf32, #tpu.memory_space<vmem>>, vector<8x256xf32>
    tpu.vector_store %arg2[%c0_8, %c0_9], %21 {strides = array<i32>} : memref<8x256xf32, #tpu.memory_space<vmem>>, vector<8x256xf32>,
    return
  }
  func.func @transform_0(%arg0: i32) -> (i32, i32) {
    %c0_i32 = arith.constant 0 : i32
    %c0_i32_0 = arith.constant 0 : i32
    return %arg0, %c0_i32 : i32, i32
  }
  func.func @transform_1(%arg0: i32) -> (i32, i32) {
    %c0_i32 = arith.constant 0 : i32
    %c0_i32_0 = arith.constant 0 : i32
    return %arg0, %c0_i32 : i32, i32
  }
}

</mosaic_0001>

<bundles_post_ra>
// kernel: saturating_poisson.1
= control target key start
LH: loop header
LB: loop body
LE: loop exit
PB: predicated region body
PF: predicated region fallthrough
CT: control target
= control target key end

     0   :  { %s70_s0 = inlined_call_operand.vmem [shape: f32[8,256], index: 0, kind: input, shape index: {}, may-alias: {0,1}]   ;;  %s71_s1 = inlined_call_operand.vmem [shape: f32[8,256], index: 1, kind: output, shape index: {}, may-alias: {0,1}]  }
   0x1   :  { %v8_v0 = vld [vmem:[%s70_s0] sm:$0xff]  ;;  %v9_v1 = vld [vmem:[%s70_s0 + $0x8] sm:$0xff] }
   0x2   :  { %v10_v2 = vmax.f32 %v8_v0, 0.0  ;;  %v11_v3 = vmax.f32 %v9_v1, 0.0 }
   0x4   :  { %v12_v4 = vmul.f32 0.041666668, %v10_v2  ;;  %v28_v5 = vsub.f32 0.0, %v10_v2  ;;  %v29_v6 = vsub.f32 0.0, %v11_v3  ;;  %v13_v7 = vmul.f32 0.041666668, %v11_v3 }
   0x5   :  { %vm26_vm0 = vcmp.lt.f32.partialorder %v10_v2, 0.03  ;;  %vm27_vm1 = vcmp.lt.f32.partialorder %v11_v3, 0.03 }
   0x6   :  { %v14_v8 = vsub.f32 0.16666667, %v12_v4  ;;  %v30_v9 = vmul.f32 1.442695, %v28_v5  ;;  %v32_v10 = vmul.f32 1.442695, %v29_v6 }
   0x7   :  { %v15_v11 = vsub.f32 0.16666667, %v13_v7 }
   0x8   :  { %v16_v12 = vmul.f32 %v14_v8, %v10_v2  ;;  %44 = vpow2.f32 %v30_v9 }
   0x9   :  { %v17_v13 = vmul.f32 %v15_v11, %v11_v3  ;;  %46 = vpow2.f32 %v32_v10 }
   0xa   :  { %v18_v14 = vadd.f32 -0.5, %v16_v12 }
   0xb   :  { %v19_v15 = vadd.f32 -0.5, %v17_v13 }
   0xc   :  { %v20_v16 = vmul.f32 %v18_v14, %v10_v2 }
   0xd   :  { %v21_v17 = vmul.f32 %v19_v15, %v11_v3 }
   0xe   :  { %v45_v18 = vpop.eup %44  ;;  %v22_v19 = vadd.f32 1.0, %v20_v16 }
   0xf   :  { %v47_v20 = vpop.eup %46  ;;  %v34_v21 = vsub.f32 1.0, %v45_v18  ;;  %v23_v22 = vadd.f32 1.0, %v21_v17 }
  0x10   :  { %v24_v23 = vmul.f32 %v22_v19, %v10_v2  ;;  %v35_v24 = vsub.f32 1.0, %v47_v20 }
  0x11   :  { %v25_v25 = vmul.f32 %v23_v22, %v11_v3 }
  0x12   :  { %v36_v26 = vsel %vm26_vm0, %v24_v23, %v34_v21 }
  0x13   :  { %38 = vst [vmem:[%s71_s1] sm:$0xff] %v36_v26  ;;  %v37_v27 = vsel %vm27_vm1, %v25_v25, %v35_v24 }
  0x14   :  { %39 = vst [vmem:[%s71_s1 + $0x8] sm:$0xff] %v37_v27 }

</bundles_post_ra>
